<compile_context>
chip_gen: v7x
topology: tpu7x:2x2x1
jax: 0.10.0
libtpu: 0.0.40
codegen_flags: <defaults>
</compile_context>

<pallas_src>
import functools

import jax
import jax.numpy as jnp
from jax import lax
from jax.experimental import pallas as pl
from jax.experimental.pallas import tpu as pltpu

_NEG = -1e9            # padding value for logits (finite -> no NaN paths)
_NUM_F32_TEMPS = 8     # upcast logits/labels, d, e, log1pe, prob_0, logit2, p2


def _round_up(x: int, m: int) -> int:
    return (x + m - 1) // m * m


def _vmem_budget_bytes() -> int:
    """~75% of per-core VMEM; generation-aware with a v7x-safe fallback."""
    phys = 64 * 1024 * 1024                      # conservative: v7x per-TC VMEM
    try:
        info = pltpu.get_tpu_info()
        cap = getattr(info, "vmem_capacity_bytes", None)
        if cap:
            phys = int(cap)
    except Exception:
        pass
    return (phys * 3) // 4                       # headroom for compiler scratch


def _choose_tile(B, C_pad, logit_bytes, label_bytes, block_rows):
    """Largest batch-tile that fits the VMEM budget (inputs + temporaries)."""
    budget = _vmem_budget_bytes()
    stream_row = C_pad * (logit_bytes + label_bytes)         # streamed bytes / row
    work_row = 2 * stream_row + _NUM_F32_TEMPS * C_pad * 4   # 2 pipe bufs + temps
    tb = budget // work_row
    cap = 4096 if block_rows is None else int(block_rows)
    tb = min(tb, cap, _round_up(B, 8))
    if B > 8:
        # keep >= 2 grid blocks so the "parallel" batch axis shards across
        # both TensorCores on v7x megacore
        tb = min(tb, _round_up((B + 1) // 2, 8))
    tb = max(8, tb - tb % 8)
    work_set = tb * work_row + 2 * 8 * 128 * 4               # + out tile (x2 bufs)
    return tb, work_set


def _atloss_kernel(logits_ref, labels_ref, out_ref, *,
                   total_rows: int, gamma_pos, eup_dtype):
    logits = logits_ref[...].astype(jnp.float32)             # [TB, Cp]
    labels = labels_ref[...].astype(jnp.float32)             # [TB, Cp]
    TB, Cp = logits.shape

    # threshold logit = column 0 of the resident tile (lane slice, free filler)
    th = logits[:, 0:1]                                      # [TB, 1]

    # labels[:, 0] = 0.0 (threshold class never counted as a positive)
    col = lax.broadcasted_iota(jnp.int32, (TB, Cp), 1)
    labels = jnp.where(col == 0, 0.0, labels)

    # ---- pairwise log_softmax over (logit_ij, th_i): 1 exp + 1 log + 1 rcp ----
    d = logits - th                                          # [TB, Cp]
    e = jnp.exp((-jnp.abs(d)).astype(eup_dtype)).astype(jnp.float32)
    log1pe = jnp.log((1.0 + e).astype(eup_dtype)).astype(jnp.float32)
    log_prob_1 = jnp.minimum(d, 0.0) - log1pe                # log p(class)
    prob_0 = jnp.where(d >= 0.0, e, 1.0) * pl.reciprocal(1.0 + e, approx=True)
    if gamma_pos == 1:
        prob_0_gamma = prob_0
    elif isinstance(gamma_pos, int) and 1 < gamma_pos <= 8:
        prob_0_gamma = prob_0                                # repeated multiplies,
        for _ in range(gamma_pos - 1):                       # no exp(g*log(x))
            prob_0_gamma = prob_0_gamma * prob_0
    else:
        prob_0_gamma = prob_0 ** gamma_pos

    loss1_part = jnp.sum(-(log_prob_1 * (1.0 + prob_0_gamma) * labels))

    # ---- loss2: column 0 of log_softmax(logits - 100*labels, axis=-1) ----
    # logit2[:, 0] == th because labels[:, 0] was zeroed; padded class columns
    # carry _NEG and contribute exactly 0 to the row logsumexp.
    logit2 = logits - labels * 100.0
    m2 = jnp.max(logit2, axis=1, keepdims=True)                          # [TB,1]
    p2 = jnp.exp((logit2 - m2).astype(eup_dtype)).astype(jnp.float32)
    lse_row = m2 + jnp.log(jnp.sum(p2, axis=1, keepdims=True))           # [TB,1]
    # mask rows that are pure batch padding
    row = lax.broadcasted_iota(jnp.int32, (TB, 1), 0) + pl.program_id(0) * TB
    valid = (row < total_rows).astype(jnp.float32)
    loss2_part = jnp.sum((lse_row - th) * valid)

    # lane-dense (8,128) tile: sublane 0 -> loss1 sum, sublane 1 -> loss2 sum
    sub = lax.broadcasted_iota(jnp.int32, (1, 8, 128), 1)
    out_ref[...] = jnp.where(sub == 0, loss1_part,
                             jnp.where(sub == 1, loss2_part, 0.0))


def atloss_cal(logits, labels, *, gamma_pos=1, block_rows=None,
               eup_dtype=jnp.float32):
    """Scalar ATLoss; batch-tiled Pallas TPU kernel + tiny JAX finalize."""
    B, C = logits.shape
    C_pad = _round_up(max(C, 1), 128)

    # TODO(synk): for very large C (C_pad >~ 8K) switch to a 2-D (batch "parallel",
    # class "arbitrary") grid with an online logsumexp for loss2 instead of
    # holding the full class row + f32 temporaries in VMEM.

    TB, work_set_bytes = _choose_tile(B, C_pad, logits.dtype.itemsize,
                                      labels.dtype.itemsize, block_rows)
    B_pad = _round_up(B, TB)
    num_blocks = B_pad // TB

    pad_b, pad_c = B_pad - B, C_pad - C
    if pad_b or pad_c:
        logits_p = jnp.pad(logits, ((0, pad_b), (0, pad_c)),
                           constant_values=_NEG)
        labels_p = jnp.pad(labels, ((0, pad_b), (0, pad_c)),
                           constant_values=0)
    else:
        logits_p, labels_p = logits, labels

    kernel = functools.partial(_atloss_kernel, total_rows=B,
                               gamma_pos=gamma_pos, eup_dtype=eup_dtype)

    stream_bytes = B_pad * C_pad * (logits.dtype.itemsize + labels.dtype.itemsize)
    cost = pl.CostEstimate(
        flops=int(16 * B_pad * C_pad),
        transcendentals=int(4 * B_pad * C_pad),     # exp, log, rcp, loss2 exp
        bytes_accessed=int(stream_bytes + num_blocks * 8 * 128 * 4),
    )

    vmem_limit = int(min(_vmem_budget_bytes(),
                         max(work_set_bytes + (4 << 20), 32 << 20)))

    parts = pl.pallas_call(
        kernel,
        out_shape=jax.ShapeDtypeStruct((num_blocks, 8, 128), jnp.float32),
        grid=(num_blocks,),
        in_specs=[
            pl.BlockSpec((TB, C_pad), lambda i: (i, 0)),    # logits
            pl.BlockSpec((TB, C_pad), lambda i: (i, 0)),    # labels
        ],
        out_specs=pl.BlockSpec((1, 8, 128), lambda i: (i, 0, 0)),
        compiler_params=pltpu.CompilerParams(
            dimension_semantics=("parallel",),
            vmem_limit_bytes=vmem_limit),
        cost_estimate=cost,
    )(logits_p, labels_p)

    loss1_sum = jnp.sum(parts[:, 0, 0])
    loss2_sum = jnp.sum(parts[:, 1, 0])
    # divide by the TRUE batch size (not B_pad) exactly once, at the end
    return loss1_sum / B + 4.0 * (loss2_sum / B)


def _atloss_ref(logits, labels, gamma_pos=1):
    # pure-JAX reference mirroring the PyTorch forward
    labels = labels.at[:, 0].set(0.0)
    th_label = jnp.zeros_like(labels).at[:, 0].set(1.0)
    n_mask = 1 - labels
    th_mask = jnp.broadcast_to(logits[:, :1], logits.shape)
    logit_th = jnp.stack([logits, th_mask], axis=1)
    log_probs = jax.nn.log_softmax(logit_th, axis=1)
    probs = jnp.exp(log_probs)
    prob_0 = probs[:, 1, :]
    prob_0_gamma = prob_0 ** gamma_pos
    log_prob_1 = log_probs[:, 0, :]
    logit2 = logits - (1 - n_mask) * 100.0
    rank2 = jax.nn.log_softmax(logit2, axis=-1)
    loss1 = -(log_prob_1 * (1 + prob_0_gamma) * labels)
    loss2 = -(rank2 * th_label).sum(1)
    return 1.0 * loss1.sum(1).mean() + 4.0 * loss2.mean()


if __name__ == "__main__":
    key = jax.random.PRNGKey(0)
    k1, k2 = jax.random.split(key)
    B, C = 100, 40  # class 0 is the threshold class
    logits_f32 = jax.random.normal(k1, (B, C), dtype=jnp.float32) * 2.0
    logits = logits_f32.astype(jnp.bfloat16)       # exercise the bf16 input path
    # labels are exact 0/1 -> keep them narrow at creation time (v5e HBM win)
    labels = jax.random.bernoulli(k2, p=0.3, shape=(B, C)).astype(jnp.bfloat16)
    labels = labels.at[:, 1].set(1.0)              # at least one positive per row

    # auto tile sizing: B=100 -> TB=56, 2 blocks (megacore-shardable), row pad masked
    loss = jax.block_until_ready(atloss_cal(logits, labels))
    ref = jax.block_until_ready(_atloss_ref(logits.astype(jnp.float32),
                                            labels.astype(jnp.float32)))
    assert jnp.allclose(loss, ref, rtol=2e-3, atol=2e-3), (loss, ref)
    # TODO(synk): ATLoss_cal.get_label (inference-time thresholding) is not part
    # of forward() and is not implemented here.
    print("KERNEL_OK")
</pallas_src>

<mosaic_0001>
module attributes {stable_mosaic.version = 11 : i64} {
  func.func @_atloss_kernel(%arg0: i32, %arg1: memref<56x128xbf16, #tpu.memory_space<vmem>>, %arg2: memref<56x128xbf16, #tpu.memory_space<vmem>>, %arg3: memref<1x8x128xf32, #tpu.memory_space<vmem>>) attributes {dimension_semantics = [#tpu.dimension_semantics<parallel>], iteration_bounds = array<i64: 2>, scalar_prefetch = 0 : i64, scratch_operands = 0 : i64, tpu.core_type = #tpu.core_type<tc>, window_params = [{transform_indices = @transform_0, window_bounds = array<i64: 56, 128>}, {transform_indices = @transform_1, window_bounds = array<i64: 56, 128>}, {transform_indices = @transform_2, window_bounds = array<i64: 1, 8, 128>}]} {
    %c0 = arith.constant 0 : index
    %c0_0 = arith.constant 0 : index
    %0 = vector.load %arg1[%c0, %c0_0] : memref<56x128xbf16, #tpu.memory_space<vmem>>, vector<56x128xbf16>
    %1 = arith.extf %0 : vector<56x128xbf16> to vector<56x128xf32>
    %c0_1 = arith.constant 0 : index
    %c0_2 = arith.constant 0 : index
    %2 = vector.load %arg2[%c0_1, %c0_2] : memref<56x128xbf16, #tpu.memory_space<vmem>>, vector<56x128xbf16>
    %3 = arith.extf %2 : vector<56x128xbf16> to vector<56x128xf32>
    %4 = vector.extract_strided_slice %1 {offsets = [0, 0], sizes = [56, 1], strides = [1, 1]} : vector<56x128xf32> to vector<56x1xf32>
    %5 = tpu.iota {dimensions = array<i32: 1>} : vector<56x128xi32>
    %c0_i32 = arith.constant 0 : i32
    %6 = vector.broadcast %c0_i32 : i32 to vector<56x128xi32>
    %7 = arith.cmpi eq, %5, %6 : vector<56x128xi32>
    %cst = arith.constant 0.000000e+00 : f32
    %8 = vector.broadcast %cst : f32 to vector<56x128xf32>
    %9 = arith.select %7, %8, %3 : vector<56x128xi1>, vector<56x128xf32>
    %10 = vector.broadcast %4 : vector<56x1xf32> to vector<56x128xf32>
    %11 = arith.subf %1, %10 : vector<56x128xf32>
    %12 = math.absf %11 : vector<56x128xf32>
    %cst_3 = arith.constant 0.000000e+00 : f32
    %13 = vector.broadcast %cst_3 : f32 to vector<56x128xf32>
    %14 = arith.subf %13, %12 : vector<56x128xf32>
    %15 = math.exp %14 : vector<56x128xf32>
    %cst_4 = arith.constant 1.000000e+00 : f32
    %16 = vector.broadcast %cst_4 : f32 to vector<56x128xf32>
    %17 = arith.addf %16, %15 : vector<56x128xf32>
    %18 = math.log %17 : vector<56x128xf32>
    %cst_5 = arith.constant 0.000000e+00 : f32
    %19 = vector.broadcast %cst_5 : f32 to vector<56x128xf32>
    %20 = arith.minimumf %11, %19 : vector<56x128xf32>
    %21 = arith.subf %20, %18 : vector<56x128xf32>
    %cst_6 = arith.constant 0.000000e+00 : f32
    %22 = vector.broadcast %cst_6 : f32 to vector<56x128xf32>
    %23 = arith.cmpf oge, %11, %22 : vector<56x128xf32>
    %cst_7 = arith.constant 1.000000e+00 : f32
    %24 = vector.broadcast %cst_7 : f32 to vector<56x128xf32>
    %25 = arith.select %23, %15, %24 : vector<56x128xi1>, vector<56x128xf32>
    %cst_8 = arith.constant 1.000000e+00 : f32
    %26 = vector.broadcast %cst_8 : f32 to vector<56x128xf32>
    %27 = arith.addf %26, %15 : vector<56x128xf32>
    %28 = tpu.reciprocal %27 {approx = true} : vector<56x128xf32> -> vector<56x128xf32>
    %29 = arith.mulf %25, %28 : vector<56x128xf32>
    %cst_9 = arith.constant 1.000000e+00 : f32
    %30 = vector.broadcast %cst_9 : f32 to vector<56x128xf32>
    %31 = arith.addf %30, %29 : vector<56x128xf32>
    %32 = arith.mulf %21, %31 : vector<56x128xf32>
    %33 = arith.mulf %32, %9 : vector<56x128xf32>
    %cst_10 = arith.constant 0.000000e+00 : f32
    %34 = vector.broadcast %cst_10 : f32 to vector<56x128xf32>
    %35 = arith.subf %34, %33 : vector<56x128xf32>
    %36 = vector.shape_cast %35 : vector<56x128xf32> to vector<1x56x128xf32>
    %cst_11 = arith.constant dense<0.000000e+00> : vector<1xf32>
    %37 = vector.multi_reduction <add>, %36, %cst_11 [1, 2] : vector<1x56x128xf32> to vector<1xf32>
    %38 = vector.shape_cast %37 : vector<1xf32> to vector<1x1x1xf32>
    %39 = vector.extract %38[0, 0, 0] : f32 from vector<1x1x1xf32>
    %cst_12 = arith.constant 1.000000e+02 : f32
    %40 = vector.broadcast %cst_12 : f32 to vector<56x128xf32>
    %41 = arith.mulf %9, %40 : vector<56x128xf32>
    %42 = arith.subf %1, %41 : vector<56x128xf32>
    %cst_13 = arith.constant dense<0xFF800000> : vector<56xf32>
    %43 = vector.multi_reduction <maximumf>, %42, %cst_13 [1] : vector<56x128xf32> to vector<56xf32>
    %44 = vector.shape_cast %43 : vector<56xf32> to vector<56x1xf32>
    %45 = vector.broadcast %44 : vector<56x1xf32> to vector<56x128xf32>
    %46 = arith.subf %42, %45 : vector<56x128xf32>
    %47 = math.exp %46 : vector<56x128xf32>
    %cst_14 = arith.constant dense<0.000000e+00> : vector<56xf32>
    %48 = vector.multi_reduction <add>, %47, %cst_14 [1] : vector<56x128xf32> to vector<56xf32>
    %49 = vector.shape_cast %48 : vector<56xf32> to vector<56x1xf32>
    %50 = math.log %49 : vector<56x1xf32>
    %51 = arith.addf %44, %50 : vector<56x1xf32>
    %52 = tpu.iota {dimensions = array<i32: 0>} : vector<56x1xi32>
    %c56_i32 = arith.constant 56 : i32
    %53 = arith.muli %arg0, %c56_i32 : i32
    %54 = vector.broadcast %53 : i32 to vector<56x1xi32>
    %55 = arith.addi %52, %54 : vector<56x1xi32>
    %c100_i32 = arith.constant 100 : i32
    %56 = vector.broadcast %c100_i32 : i32 to vector<56x1xi32>
    %57 = arith.cmpi slt, %55, %56 : vector<56x1xi32>
    %58 = arith.extui %57 : vector<56x1xi1> to vector<56x1xi32>
    %59 = arith.sitofp %58 : vector<56x1xi32> to vector<56x1xf32>
    %60 = arith.subf %51, %4 : vector<56x1xf32>
    %61 = arith.mulf %60, %59 : vector<56x1xf32>
    %62 = vector.shape_cast %61 : vector<56x1xf32> to vector<1x56x1xf32>
    %cst_15 = arith.constant dense<0.000000e+00> : vector<1xf32>
    %63 = vector.multi_reduction <add>, %62, %cst_15 [1, 2] : vector<1x56x1xf32> to vector<1xf32>
    %64 = vector.shape_cast %63 : vector<1xf32> to vector<1x1x1xf32>
    %65 = vector.extract %64[0, 0, 0] : f32 from vector<1x1x1xf32>
    %66 = tpu.iota {dimensions = array<i32: 1>} : vector<1x8x128xi32>
    %c0_i32_16 = arith.constant 0 : i32
    %67 = vector.broadcast %c0_i32_16 : i32 to vector<1x8x128xi32>
    %68 = arith.cmpi eq, %66, %67 : vector<1x8x128xi32>
    %c1_i32 = arith.constant 1 : i32
    %69 = vector.broadcast %c1_i32 : i32 to vector<1x8x128xi32>
    %70 = arith.cmpi eq, %66, %69 : vector<1x8x128xi32>
    %cst_17 = arith.constant 0.000000e+00 : f32
    %71 = vector.broadcast %65 : f32 to vector<1x8x128xf32>
    %72 = vector.broadcast %cst_17 : f32 to vector<1x8x128xf32>
    %73 = arith.select %70, %71, %72 : vector<1x8x128xi1>, vector<1x8x128xf32>
    %74 = vector.broadcast %39 : f32 to vector<1x8x128xf32>
    %75 = arith.select %68, %74, %73 : vector<1x8x128xi1>, vector<1x8x128xf32>
    %c0_18 = arith.constant 0 : index
    %c0_19 = arith.constant 0 : index
    %c0_20 = arith.constant 0 : index
    %76 = vector.load %arg3[%c0_18, %c0_19, %c0_20] : memref<1x8x128xf32, #tpu.memory_space<vmem>>, vector<1x8x128xf32>
    tpu.vector_store %arg3[%c0_18, %c0_19, %c0_20], %75 {strides = array<i32>} : memref<1x8x128xf32, #tpu.memory_space<vmem>>, vector<1x8x128xf32>,
    return
  }
  func.func @transform_0(%arg0: i32) -> (i32, i32) {
    %c0_i32 = arith.constant 0 : i32
    %c0_i32_0 = arith.constant 0 : i32
    return %arg0, %c0_i32 : i32, i32
  }
  func.func @transform_1(%arg0: i32) -> (i32, i32) {
    %c0_i32 = arith.constant 0 : i32
    %c0_i32_0 = arith.constant 0 : i32
    return %arg0, %c0_i32 : i32, i32
  }
  func.func @transform_2(%arg0: i32) -> (i32, i32, i32) {
    %c0_i32 = arith.constant 0 : i32
    %c0_i32_0 = arith.constant 0 : i32
    %c0_i32_1 = arith.constant 0 : i32
    return %arg0, %c0_i32, %c0_i32_0 : i32, i32, i32
  }
}

</mosaic_0001>

<bundles_post_ra>
// kernel: tpu_custom_call.1
= control target key start
LH: loop header
LB: loop body
LE: loop exit
PB: predicated region body
PF: predicated region fallthrough
CT: control target
= control target key end

     0   :  { %7 = vsyncpa [#allocation3], 0  ;;  %s1429_s0 = inlined_call_operand.hbm [shape: bf16[112,128], index: 0, kind: input, shape index: {}]   ;;  %s1430_s1 = inlined_call_operand.hbm [shape: bf16[112,128], index: 1, kind: input, shape index: {}]   ;;  %s1431_s2 = inlined_call_operand.hbm [shape: f32[2,8,128], index: 2, kind: output, shape index: {}]  }
   0x1   :  { %9 = vsyncpa [#allocation3 + $0x1], 0 }
   0x2   :  { %10 = vsyncpa [#allocation6], 0 }
   0x3   :  { %12 = vsyncpa [#allocation6 + $0x1], 0 }
   0x4   :  { %13 = vsyncpa [#allocation4], 0 }
   0x5   :  { %15 = vsyncpa [#allocation4 + $0x1], 0  ;;  %s1042_s9 = smov 0   ;;  %s1044_s10 = smov 0  }
   0x6   :  { %s1046_s11 = smov 0   ;;  %s1048_s12 = smov 0  }
   0x7 LB: > { %s1063_s13 = sadd.s32 4294967295, %s1018_s12   ;;  %s691_s14 = sadd.s32 4294967294, %s1018_s12   ;;  %s1018_s12 = sphi %s1048_s12, %s1446_s12   ;;  %s1014_s11 = sphi %s1046_s11, %s1445_s11   ;;  %s1010_s10 = sphi %s1044_s10, %s1444_s10   ;;  %s1006_s9 = sphi %s1042_s9, %s1443_s9  }
   0x8   : > { %s1067_s15 = sadd.s32 1, %s1018_s12   ;;  %s28_s16 = sadd.s32 1, %s1014_s11 }
   0x9   : > { %s25_s17 = ssub.s32 %s1018_s12, %s1067_s15  ;;  %p35_p0 = scmp.ne.s32.totalorder %s1014_s11, %s1010_s10 }
   0xa   : > { %p26_p1 = scmp.eq.s32.totalorder %s25_s17, 0  ;;  %p36_p2 = scmp.eq.s32.totalorder %s1018_s12, 0 }
   0xb   : > { %p41_p3 = scmp.ne.s32.totalorder %s1010_s10, %s1006_s9  ;;  %p42_p4 = scmp.eq.s32.totalorder %s1063_s13, 0 }
   0xc   : > { %s1079_s18 = scalar_select %p26_p1, %s1014_s11, %s28_s16  }
   0xd   : > { %p37_p5 = por %p36_p2, %p35_p0  ;;  %p1081_p6 = por %p42_p4, %p41_p3 }
   0xe   : > { %p91_p7 = scmp.eq.s32.totalorder %s1063_s13, 1  ;;  %p97_p8 = scmp.eq.s32.totalorder %s691_s14, 1 }
   0xf   : > { %s1434_s19 = scalar_select %p1081_p6, 1, 0 }
  0x10   : > { %p763_p10 = scmp.lt.s32.totalorder %s1018_s12, 2  ;;  %p1088_p11 = por %p91_p7, %p35_p0 }
  0x11   : > { %p1092_p12 = por %p97_p8, %p41_p3  ;;  %s1097_s22 = sand.u32 1, %s1014_s11  }
  0x12   : > { %s1435_s20 = scalar_select %p1088_p11, 1, 0 }
  0x13   : > { %s1436_s21 = scalar_select %p1092_p12, 1, 0 }
  0x14   : > { %s709_s23 = smul.u32 448, %s1018_s12  ;;  %p1108_p13 = pnand %p763_p10, %p37_p5 }
  0x15   : > { %s739_s24 = smul.u32 28, %s1097_s22  ;;  %s118_s3 = scalar_lea.sflag [#allocation3], %s1097_s22 }
  0x16   : > { %s1106_s27 = scalar_lea.hbm %s1429_s0, %s709_s23  ;;  %p890_p1 = pneg %p1108_p13 }
  0x17   : > { %s121_s29 = scalar_lea.vmem [#allocation2], %s739_s24  ;;  %s888_s4 = scalar_lea.hbm %s1106_s27, 448 }
  0x18   : > { %s128_s30 = sshll.u32 %s121_s29, 4  ;;  %p889_p0 = scmp.ne.s32.totalorder %s1106_s27, %s888_s4  ;;  %s1114_s30 = int_to_ptr.vmem [resolvable:$true] %s128_s30 }
  0x19   : > { %s893_s7 = scalar_lea.hbm %s1429_s0, 896  ;;  %p894_p4 = scmp.lt.u32.totalorder %s1106_s27, %s1429_s0 }
  0x1a   : > { %p891_p2 = pnand %p890_p1, %p889_p0  ;;  %p895_p5 = scmp.lt.u32.totalorder %s893_s7, %s888_s4 }
  0x1b   : > { %p897_p8 = scmp.lt.u32.totalorder %s888_s4, %s1106_s27 }
  0x1c   : > { %p892_p3 = pneg %p891_p2  ;;  %p896_p7 = por %p895_p5, %p894_p4 }
  0x1e   : > { %p898_p10 = por %p897_p8, %p896_p7 }
  0x20   : > { %p899_p9 = pnand %p898_p10, %p892_p3 }
  0x22   : > { %902 = shalt.err (!%p899_p9)
}
  0x23   : > { %s903_s16 = scalar_lea.vmem %s1114_s30, 448  ;;  %s1020_s17 = smov [#allocation2]  }
  0x24   : > { %p904_p0 = scmp.ne.s32.totalorder %s1114_s30, %s903_s16  ;;  %s908_s25 = sshll.u32 %s1020_s17, 4  ;;  %s909_s25 = int_to_ptr.vmem [resolvable:$false] %s908_s25 }
  0x25   : > { %s910_s26 = scalar_lea.vmem %s909_s25, 896  ;;  %p911_p11 = scmp.lt.s32.totalorder %s1114_s30, %s909_s25 }
  0x26   : > { %p906_p2 = pnand %p904_p0, %p890_p1  ;;  %p912_p4 = scmp.lt.s32.totalorder %s910_s26, %s903_s16 }
  0x28   : > { %p907_p12 = pneg %p906_p2  ;;  %p913_p5 = por %p912_p4, %p911_p11 }
  0x2a   : > { %p914_p7 = pnand %p913_p5, %p907_p12 }
  0x2c   : > { %917 = shalt.err (!%p914_p7)
}
  0x2d   : > { %s1021_s29 = smov 64   ;;  %s1022_s4 = smov 4  }
  0x2e   : > { %755 = dma.hbm_to_vmem [thread:$0]  (!%p1108_p13), %s1106_s27, 448, %s1114_s30, %s118_s3, %s1021_s29, %s1021_s29, %s1022_s4  }
  0x2f   : > { %p696_p9 = scmp.ge.s32.totalorder %s1018_s12, 1  ;;  %p157_p11 = scmp.lt.s32.totalorder %s1018_s12, 3 }
  0x30   : > { %s1158_s8 = scalar_lea.hbm %s1430_s1, %s709_s23  ;;  %s142_s14 = scalar_lea.vmem [#allocation5], %s739_s24 }
  0x31   : > { %p1149_p12 = pnand %p696_p9, %p157_p11  ;;  %s149_s16 = sshll.u32 %s142_s14, 4  ;;  %s1162_s16 = int_to_ptr.vmem [resolvable:$true] %s149_s16 }
  0x32   : > { %s139_s27 = scalar_lea.sflag [#allocation6], %s1097_s22  ;;  %s918_s30 = scalar_lea.hbm %s1158_s8, 448 }
  0x33   : > { %p919_p3 = scmp.ne.s32.totalorder %s1158_s8, %s918_s30  ;;  %s923_s23 = scalar_lea.hbm %s1430_s1, 896 }
  0x34   : > { %p924_p0 = scmp.lt.u32.totalorder %s1158_s8, %s1430_s1  ;;  %p925_p2 = scmp.lt.u32.totalorder %s923_s23, %s918_s30 }
  0x35   : > { %p921_p8 = pnand %p919_p3, %p890_p1  ;;  %p927_p5 = scmp.lt.u32.totalorder %s918_s30, %s1158_s8 }
  0x36   : > { %p926_p4 = por %p925_p2, %p924_p0 }
  0x37   : > { %p922_p10 = pneg %p921_p8 }
  0x38   : > { %p928_p7 = por %p927_p5, %p926_p4 }
  0x3a   : > { %p929_p9 = pnand %p928_p7, %p922_p10 }
  0x3c   : > { %932 = shalt.err (!%p929_p9)
}
  0x3d   : > { %s933_s24 = scalar_lea.vmem %s1162_s16, 448  ;;  %s1023_s6 = smov [#allocation5]  }
  0x3e   : > { %p934_p11 = scmp.ne.s32.totalorder %s1162_s16, %s933_s24  ;;  %s938_s7 = sshll.u32 %s1023_s6, 4  ;;  %s939_s7 = int_to_ptr.vmem [resolvable:$false] %s938_s7 }
  0x3f   : > { %s940_s14 = scalar_lea.vmem %s939_s7, 896  ;;  %p941_p6 = scmp.lt.s32.totalorder %s1162_s16, %s939_s7 }
  0x40   : > { %p936_p3 = pnand %p934_p11, %p890_p1  ;;  %p942_p0 = scmp.lt.s32.totalorder %s940_s14, %s933_s24 }
  0x42   : > { %p937_p8 = pneg %p936_p3  ;;  %p943_p2 = por %p942_p0, %p941_p6 }
  0x44   : > { %p944_p4 = pnand %p943_p2, %p937_p8 }
  0x46   : > { %947 = shalt.err (!%p944_p4)
}
  0x47   : > { %758 = dma.hbm_to_vmem [thread:$0]  (!%p1108_p13), %s1158_s8, 448, %s1162_s16, %s139_s27, %s1021_s29, %s1021_s29, %s1022_s4  }
  0x48   : > { %161 = sbr.rel (%p1149_p12) target bundleno = 654 (0x28e), region = 28  ;;  %s1196_s30 = sand.u32 (!%p1149_p12), 1, %s1010_s10  }
  0x49   : > { %s741_s3 = smul.u32 (!%p1149_p12), 28, %s1196_s30  ;;  %s164_s17 = scalar_lea.sflag (!%p1149_p12), [#allocation3], %s1196_s30 }
  0x4a   : > { %p1439_p6 = scmp.ne.s32.totalorder (!%p1149_p12), %s1434_s19, 0 }
  0x4b   : > { %s1200_s28 = scalar_lea.vmem (!%p1149_p12), [#allocation2], %s741_s3 }
  0x4f   : > { %993 = dma.done.wait (%p1439_p6), %s164_s17, 448  }
  0x50   : > { %995 = vsyncadd (%p1439_p6), %s164_s17, 4294966848  ;;  %s173_s22 = scalar_lea.sflag [#allocation6], %s1196_s30  ;;  %s176_s29 = scalar_lea.vmem [#allocation5], %s741_s3 }
  0x51   : > { %997 = dma.done.wait (%p1439_p6), %s173_s22, 448  }
  0x52   : > { %999 = vsyncadd (%p1439_p6), %s173_s22, 4294966848  ;;  %v232_v0 = vlaneseq  ;;  %v1024_v1 = vmov 0   ;;  %v712_v3 = vld [vmem:[%s1200_s28] sm:$0xff]   ;;  %v724_v4 = vld [vmem:[%s176_s29] sm:$0xff]   ;;  %s510_s19 = smul.u32 56, %s1063_s13  ;;  %vm554_vm12 = vcmask 7168  }
  0x53   : > { %801 = vset.pattern.permute.xlu1 %v1024_v1  ;;  %807 = vset.pattern.permute.xlu0 %v1024_v1  ;;  %v735_v5 = vld [vmem:[%s1200_s28 + $0x8] sm:$0xff]   ;;  %v1214_v6 = vunpack.c.l.bf16 %v712_v3  ;;  %v725_v7 = vunpack.c.l.bf16 %v724_v4  ;;  %v737_v8 = vld [vmem:[%s176_s29 + $0x8] sm:$0xff]   ;;  %v726_v12 = vunpack.c.h.bf16 %v724_v4  ;;  %v1221_v15 = vunpack.c.h.bf16 %v712_v3  ;;  %v224_v22 = vld [vmem:[%s176_s29 + $0x18] sm:$0xf]  ;;  %s697_s4 = sshll.u32 %s1196_s30, 3  ;;  %s706_s5 = sshll.u32 %s1063_s13, 7 }
  0x54   : > { %v233_v2 = vand.u32 127, %v232_v0  ;;  %v738_v9 = vld [vmem:[%s176_s29 + $0x10] sm:$0xff]   ;;  %v1216_v10 = vunpack.c.l.bf16 %v735_v5  ;;  %v729_v11 = vunpack.c.l.bf16 %v737_v8  ;;  %v730_v13 = vunpack.c.h.bf16 %v737_v8  ;;  %v736_v26 = vld [vmem:[%s1200_s28 + $0x10] sm:$0xff]   ;;  %v210_v39 = vld [vmem:[%s1200_s28 + $0x18] sm:$0xf]  ;;  %s201_s16 = scalar_lea.vmem [#allocation7], %s697_s4  ;;  %s1385_s24 = scalar_lea.hbm %s1431_s2, %s706_s5 }
  0x55   : > { %v1223_v16 = vunpack.c.h.bf16 %v735_v5  ;;  %v733_v17 = vunpack.c.l.bf16 %v738_v9  ;;  %v734_v29 = vunpack.c.h.bf16 %v738_v9  ;;  %v231_v31 = vunpack.c.l.bf16 %v224_v22  ;;  %s598_s27 = sshll.u32 %s201_s16, 4  ;;  %s585_s13 = scalar_lea.sflag [#allocation4], %s1196_s30  ;;  %s1387_s27 = int_to_ptr.vmem [resolvable:$true] %s598_s27 }
  0x56   : > { %vm234_vm0 = vcmp.eq.s32.totalorder %v233_v2, 0  ;;  %v1245_v33 = vunpack.c.l.bf16 %v736_v26  ;;  %v1252_v37 = vunpack.c.h.bf16 %v736_v26  ;;  %v1260_v42 = vunpack.c.l.bf16 %v210_v39  ;;  %s948_s6 = scalar_lea.vmem %s1387_s27, 128  ;;  %p1440_p1 = scmp.ne.s32.totalorder %s1435_s20, 0 }
  0x57   : > { %v1219_v14 = vsel %vm234_vm0, 0.0, %v725_v7  ;;  %v1227_v19 = vsel %vm234_vm0, 0.0, %v729_v11  ;;  %v1230_v20 = vsel %vm234_vm0, 0.0, %v726_v12  ;;  %v1233_v21 = vsel %vm234_vm0, 0.0, %v730_v13  ;;  %p949_p13 = scmp.ne.s32.totalorder %s1387_s27, %s948_s6  ;;  %s1026_s7 = smov [#allocation7]  }
  0x58   : > { %v418_v18 = vmul.f32 100.0, %v1219_v14  ;;  %v420_v23 = vmul.f32 100.0, %v1227_v19  ;;  %v419_v24 = vmul.f32 100.0, %v1230_v20  ;;  %v421_v25 = vmul.f32 100.0, %v1233_v21  ;;  %s952_s14 = sshll.u32 %s1026_s7, 4  ;;  %s953_s14 = int_to_ptr.vmem [resolvable:$false] %s952_s14 }
  0x59   : > { %v1240_v27 = vsel %vm234_vm0, 0.0, %v733_v17  ;;  %v1249_v35 = vsel %vm234_vm0, 0.0, %v734_v29  ;;  %v1257_v40 = vsel %vm234_vm0, 0.0, %v231_v31  ;;  %v802_v46 = vpack.i.bf16 %v1221_v15, %v1214_v6  ;;  %p950_p12 = pnand %p949_p13, %p1440_p1  ;;  %s954_s3 = scalar_lea.vmem %s953_s14, 256 }
  0x5a   : > { %v425_v28 = vsub.f32 %v1214_v6, %v418_v18  ;;  %v427_v30 = vsub.f32 %v1216_v10, %v420_v23  ;;  %v426_v32 = vsub.f32 %v1221_v15, %v419_v24  ;;  %v422_v34 = vmul.f32 100.0, %v1240_v27  ;;  %p955_p5 = scmp.lt.s32.totalorder %s1387_s27, %s953_s14  ;;  %p956_p7 = scmp.lt.s32.totalorder %s954_s3, %s948_s6 }
  0x5b   : > { %v428_v36 = vsub.f32 %v1223_v16, %v421_v25  ;;  %v423_v38 = vmul.f32 100.0, %v1249_v35  ;;  %v424_v43 = vmul.f32 100.0, %v1257_v40  ;;  %v813_v47 = vpack.i.bf16 %v1252_v37, %v1245_v33  ;;  %p951_p10 = pneg %p950_p12 }
  0x5c   : > { %432 = vmax.xlane.f32.xlu0 %v425_v28  ;;  %436 = vmax.xlane.f32.xlu1 %v427_v30  ;;  %v429_v41 = vsub.f32 %v1245_v33, %v422_v34  ;;  %v808_v48 = vpack.i.bf16 %v1223_v16, %v1216_v10  ;;  %p957_p9 = por %p956_p7, %p955_p5 }
  0x5d   : > { %v430_v44 = vsub.f32 %v1252_v37, %v423_v38  ;;  %v431_v45 = vsub.f32 %v1260_v42, %v424_v43 }
  0x5e   : > { %p958_p11 = pnand %p957_p9, %p951_p10 }
  0x60   : > { %434 = vmax.xlane.f32.xlu0 %v426_v32  ;;  %438 = vmax.xlane.f32.xlu1 %v428_v36 }
  0x64   : > { %440 = vmax.xlane.f32.xlu0 %v429_v41  ;;  %442 = vmax.xlane.f32.xlu1 %v430_v44 }
  0x68   : > { %444 = vmax.xlane.f32.xlu0 %v431_v45 }
  0x75   : > { %803 = vperm.xlu1 %801, %v802_v46  }
  0x79   : > { %814 = vperm.xlu1 %801, %v813_v47  }
  0x7d   : > { %274 = vperm.xlu1 %801, %v1260_v42  }
  0x7e   : > { %809 = vperm.xlu0 %807, %v808_v48  }
  0xe9   : > { %v1272_v49 = vpop.xlane.xlu0 %432  ;;  %v1275_v51 = vpop.xlane.xlu1 %436 }
  0xea   : > { %v446_v50 = vsub.f32 %v425_v28, %v1272_v49  ;;  %v448_v52 = vsub.f32 %v427_v30, %v1275_v51 }
  0xec   : > { %v453_v53 = vmul.f32 1.442695, %v446_v50  ;;  %v457_v54 = vmul.f32 1.442695, %v448_v52 }
  0xed   : > { %v1278_v55 = vpop.xlane.xlu0 %434  ;;  %v1281_v57 = vpop.xlane.xlu1 %438 }
  0xee   : > { %818 = vpow2.f32 %v453_v53  ;;  %v447_v56 = vsub.f32 %v426_v32, %v1278_v55  ;;  %v449_v58 = vsub.f32 %v428_v36, %v1281_v57 }
  0xef   : > { %820 = vpow2.f32 %v457_v54 }
  0xf0   : > { %v455_v59 = vmul.f32 1.442695, %v447_v56  ;;  %v459_v60 = vmul.f32 1.442695, %v449_v58 }
  0xf1   : > { %v1284_v61 = vpop.xlane.xlu0 %440  ;;  %v1287_v63 = vpop.xlane.xlu1 %442 }
  0xf2   : > { %822 = vpow2.f32 %v455_v59  ;;  %v450_v62 = vsub.f32 %v429_v41, %v1284_v61  ;;  %v451_v2 = vsub.f32 %v430_v44, %v1287_v63 }
  0xf3   : > { %824 = vpow2.f32 %v459_v60 }
  0xf4   : > { %v461_v1 = vmul.f32 1.442695, %v450_v62  ;;  %v463_v11 = vmul.f32 1.442695, %v451_v2 }
  0xf5   : > { %v1290_v3 = vpop.xlane.xlu0 %444  ;;  %v804_v4 = vpop.permute.xlu1 %803 }
  0xf6   : > { %v452_v5 = vsub.f32 %v431_v45, %v1290_v3  ;;  %v806_v7 = vunpack.i.h.bf16 %v804_v4  ;;  %v805_v8 = vunpack.i.l.bf16 %v804_v4  ;;  %826 = vpow2.f32 %v461_v1 }
  0xf7   : > { %828 = vpow2.f32 %v463_v11 }
  0xf8   : > { %v819_v9 = vpop.eup %818  ;;  %v1294_v12 = vsub.f32 %v1221_v15, %v806_v7  ;;  %v1297_v13 = vsub.f32 %v1214_v6, %v805_v8  ;;  %v465_v22 = vmul.f32 1.442695, %v452_v5 }
  0xf9   : > { %467 = vadd.xlane.f32.xlu1 %v819_v9  ;;  %v821_v17 = vpop.eup %820  ;;  %v815_v18 = vpop.permute.xlu1 %814 }
  0xfa   : > { %v285_v23 = vand.u32 2147483647, %v1294_v12  ;;  %v284_v24 = vand.u32 2147483647, %v1297_v13  ;;  %v817_v26 = vunpack.i.h.bf16 %v815_v18  ;;  %v816_v28 = vunpack.i.l.bf16 %v815_v18 }
  0xfb   : > { %830 = vpow2.f32 %v465_v22  ;;  %vm348_vm1 = vcmp.ge.f32.partialorder %v1294_v12, 0.0  ;;  %vm347_vm2 = vcmp.ge.f32.partialorder %v1297_v13, 0.0 }
  0xfc   : > { %v823_v25 = vpop.eup %822  ;;  %v292_v29 = vsub.f32 0.0, %v285_v23  ;;  %v291_v30 = vsub.f32 0.0, %v284_v24  ;;  %v1302_v38 = vsub.f32 %v1252_v37, %v817_v26  ;;  %v1305_v39 = vsub.f32 %v1245_v33, %v816_v28 }
  0xfd   : > { %471 = vadd.xlane.f32.xlu1 %v821_v17  ;;  %469 = vadd.xlane.f32.xlu0 %v823_v25  ;;  %v810_v31 = vpop.permute.xlu0 %809  ;;  %v825_v32 = vpop.eup %824 }
  0xfe   : > { %v812_v34 = vunpack.i.h.bf16 %v810_v31  ;;  %v811_v36 = vunpack.i.l.bf16 %v810_v31  ;;  %v275_v41 = vpop.permute.xlu1 %274  ;;  %v300_v43 = vmul.f32 1.442695, %v292_v29  ;;  %v298_v44 = vmul.f32 1.442695, %v291_v30 }
  0xff   : > { %v289_v47 = vand.u32 2147483647, %v1302_v38  ;;  %v1315_v48 = vsub.f32 %v1260_v42, %v275_v41  ;;  %v288_v50 = vand.u32 2147483647, %v1305_v39  ;;  %vm352_vm5 = vcmp.ge.f32.partialorder %v1302_v38, 0.0 }
 0x100   : > { %v1308_v45 = vsub.f32 %v1223_v16, %v812_v34  ;;  %v1311_v46 = vsub.f32 %v1216_v10, %v811_v36  ;;  %832 = vpow2.f32 %v300_v43  ;;  %v827_v52 = vpop.eup %826  ;;  %v334_v36 = vmin.f32 %v1294_v12, 0.0 }
 0x101   : > { %473 = vadd.xlane.f32.xlu1 %v825_v32  ;;  %834 = vpow2.f32 %v298_v44  ;;  %v296_v56 = vsub.f32 0.0, %v289_v47  ;;  %v295_v59 = vsub.f32 0.0, %v288_v50  ;;  %v290_v60 = vand.u32 2147483647, %v1315_v48  ;;  %v829_v2 = vpop.eup %828 }
 0x102   : > { %v287_v53 = vand.u32 2147483647, %v1308_v45  ;;  %v286_v54 = vand.u32 2147483647, %v1311_v46  ;;  %vm350_vm3 = vcmp.ge.f32.partialorder %v1308_v45, 0.0  ;;  %vm349_vm4 = vcmp.ge.f32.partialorder %v1311_v46, 0.0 }
 0x103   : > { %v308_v1 = vmul.f32 1.442695, %v296_v56  ;;  %v306_v5 = vmul.f32 1.442695, %v295_v59  ;;  %v297_v7 = vsub.f32 0.0, %v290_v60  ;;  %vm351_vm6 = vcmp.ge.f32.partialorder %v1305_v39, 0.0 }
 0x104   : > { %v294_v58 = vsub.f32 0.0, %v287_v53  ;;  %v293_v62 = vsub.f32 0.0, %v286_v54  ;;  %vm353_vm7 = vcmp.ge.f32.partialorder %v1315_v48, 0.0 }
 0x105   : > { %475 = vadd.xlane.f32.xlu1 %v827_v52  ;;  %836 = vpow2.f32 %v308_v1  ;;  %v310_v9 = vmul.f32 1.442695, %v297_v7  ;;  %v831_v11 = vpop.eup %830  ;;  %v333_v52 = vmin.f32 %v1297_v13, 0.0 }
 0x106   : > { %v304_v4 = vmul.f32 1.442695, %v294_v58  ;;  %v302_v8 = vmul.f32 1.442695, %v293_v62 }
 0x108   : > { %838 = vpow2.f32 %v304_v4 }
 0x109   : > { %477 = vadd.xlane.f32.xlu1 %v829_v2  ;;  %840 = vpow2.f32 %v302_v8 }
 0x10a   : > { %842 = vpow2.f32 %v306_v5  ;;  %v833_v17 = vpop.eup %832  ;;  %v336_v5 = vmin.f32 %v1308_v45, 0.0  ;;  %v337_v45 = vmin.f32 %v1305_v39, 0.0 }
 0x10b   : > { %844 = vpow2.f32 %v310_v9  ;;  %v835_v18 = vpop.eup %834  ;;  %v313_v22 = vadd.f32 1.0, %v833_v17  ;;  %v355_v41 = vsel %vm348_vm1, %v833_v17, 1.0  ;;  %v335_v9 = vmin.f32 %v1311_v46, 0.0 }
 0x10c   : > { %v312_v23 = vadd.f32 1.0, %v835_v18  ;;  %v354_v53 = vsel %vm347_vm2, %v835_v18, 1.0 }
 0x10d   : > { %479 = vadd.xlane.f32.xlu1 %v831_v11  ;;  %846 = vlog2.f32 %v313_v22 }
 0x10e   : > { %848 = vrcp.f32 %v313_v22 }
 0x10f   : > { %850 = vlog2.f32 %v312_v23  ;;  %v837_v24 = vpop.eup %836 }
 0x110   : > { %852 = vrcp.f32 %v312_v23  ;;  %v317_v26 = vadd.f32 1.0, %v837_v24 }
 0x112   : > { %v839_v25 = vpop.eup %838  ;;  %854 = vrcp.f32 %v317_v26 }
 0x113   : > { %v841_v28 = vpop.eup %840  ;;  %v315_v29 = vadd.f32 1.0, %v839_v25  ;;  %v357_v7 = vsel %vm350_vm3, %v839_v25, 1.0 }
 0x114   : > { %v843_v30 = vpop.eup %842  ;;  %v314_v31 = vadd.f32 1.0, %v841_v28  ;;  %v356_v22 = vsel %vm349_vm4, %v841_v28, 1.0  ;;  %v339_v28 = vmin.f32 %v1315_v48, 0.0 }
 0x115   : > { %v845_v32 = vpop.eup %844  ;;  %856 = vlog2.f32 %v315_v29  ;;  %v316_v34 = vadd.f32 1.0, %v843_v30 }
 0x116   : > { %858 = vrcp.f32 %v315_v29  ;;  %v318_v43 = vadd.f32 1.0, %v845_v32 }
 0x117   : > { %860 = vlog2.f32 %v314_v31  ;;  %v847_v44 = vpop.eup %846 }
 0x118   : > { %862 = vrcp.f32 %v314_v31  ;;  %v849_v47 = vpop.eup %848  ;;  %v322_v50 = vmul.f32 0.6931472, %v847_v44  ;;  %v359_v31 = vsel %vm352_vm5, %v837_v24, 1.0 }
 0x119   : > { %864 = vlog2.f32 %v316_v34  ;;  %v851_v54 = vpop.eup %850  ;;  %v369_v56 = vmul.f32 %v849_v47, %v355_v41 }
 0x11a   : > { %866 = vrcp.f32 %v316_v34  ;;  %v853_v58 = vpop.eup %852  ;;  %v341_v59 = vsub.f32 %v334_v36, %v322_v50  ;;  %v320_v60 = vmul.f32 0.6931472, %v851_v54  ;;  %v358_v36 = vsel %vm351_vm6, %v843_v30, 1.0 }
 0x11b   : > { %868 = vlog2.f32 %v318_v43  ;;  %v376_v12 = vadd.f32 1.0, %v369_v56  ;;  %v368_v62 = vmul.f32 %v853_v58, %v354_v53 }
 0x11c   : > { %870 = vrcp.f32 %v318_v43  ;;  %v340_v1 = vsub.f32 %v333_v52, %v320_v60  ;;  %v855_v13 = vpop.eup %854 }
 0x11d   : > { %872 = vlog2.f32 %v317_v26  ;;  %v383_v2 = vmul.f32 %v376_v12, %v341_v59  ;;  %v375_v4 = vadd.f32 1.0, %v368_v62  ;;  %v373_v53 = vmul.f32 %v855_v13, %v359_v31 }
 0x11f   : > { %v857_v8 = vpop.eup %856  ;;  %v382_v17 = vmul.f32 %v375_v4, %v340_v1  ;;  %v390_v23 = vmul.f32 %v383_v2, %v1230_v20  ;;  %v360_v20 = vsel %vm353_vm7, %v845_v32, 1.0 }
 0x120   : > { %v859_v11 = vpop.eup %858  ;;  %v326_v18 = vmul.f32 0.6931472, %v857_v8 }
 0x121   : > { %v861_v26 = vpop.eup %860  ;;  %v371_v29 = vmul.f32 %v859_v11, %v357_v7  ;;  %v389_v41 = vmul.f32 %v382_v17, %v1219_v14  ;;  %v397_v54 = vsub.f32 0.0, %v390_v23  ;;  %v338_v14 = vmin.f32 %v1302_v38, 0.0 }
 0x122   : > { %v863_v25 = vpop.eup %862  ;;  %v343_v34 = vsub.f32 %v336_v5, %v326_v18  ;;  %v324_v46 = vmul.f32 0.6931472, %v861_v26  ;;  %v380_v7 = vadd.f32 1.0, %v373_v53 }
 0x123   : > { %v865_v43 = vpop.eup %864  ;;  %v378_v44 = vadd.f32 1.0, %v371_v29  ;;  %v370_v47 = vmul.f32 %v863_v25, %v356_v22  ;;  %v396_v30 = vsub.f32 0.0, %v389_v41 }
 0x124   : > { %v867_v50 = vpop.eup %866  ;;  %v342_v52 = vsub.f32 %v335_v9, %v324_v46  ;;  %v328_v24 = vmul.f32 0.6931472, %v865_v43 }
 0x125   : > { %v869_v39 = vpop.eup %868  ;;  %v377_v56 = vadd.f32 1.0, %v370_v47  ;;  %v372_v58 = vmul.f32 %v867_v50, %v358_v36  ;;  %v385_v59 = vmul.f32 %v378_v44, %v343_v34  ;;  %v403_v17 = vadd.f32 %v397_v54, %v396_v30 }
 0x126   : > { %v871_v60 = vpop.eup %870  ;;  %v344_v12 = vsub.f32 %v337_v45, %v328_v24  ;;  %v332_v62 = vmul.f32 0.6931472, %v869_v39 }
 0x127   : > { %v873_v1 = vpop.eup %872  ;;  %v384_v2 = vmul.f32 %v377_v56, %v342_v52  ;;  %v379_v4 = vadd.f32 1.0, %v372_v58  ;;  %v374_v48 = vmul.f32 %v871_v60, %v360_v20  ;;  %v392_v32 = vmul.f32 %v385_v59, %v1233_v21 }
 0x128   : > { %v346_v5 = vsub.f32 %v339_v28, %v332_v62  ;;  %v330_v13 = vmul.f32 0.6931472, %v873_v1  ;;  %v511_v20 = vstv %s510_s19 }
 0x129   : > { %v381_v8 = vadd.f32 1.0, %v374_v48  ;;  %v386_v9 = vmul.f32 %v379_v4, %v344_v12  ;;  %v391_v11 = vmul.f32 %v384_v2, %v1227_v19  ;;  %v399_v26 = vsub.f32 0.0, %v392_v32 }
 0x12a   : > { %v345_v18 = vsub.f32 %v338_v14, %v330_v13 }
 0x12b   : > { %v388_v22 = vmul.f32 %v381_v8, %v346_v5  ;;  %v393_v38 = vmul.f32 %v386_v9, %v1240_v27  ;;  %v398_v23 = vsub.f32 0.0, %v391_v11 }
 0x12c   : > { %v387_v29 = vmul.f32 %v380_v7, %v345_v18 }
 0x12d   : > { %v395_v31 = vmul.f32 %v388_v22, %v1257_v40  ;;  %v400_v45 = vsub.f32 0.0, %v393_v38  ;;  %v404_v21 = vadd.f32 %v403_v17, %v398_v23  ;;  %v1348_v40 = vshrl.u32 %v232_v0, 7 }
 0x12e   : > { %v394_v25 = vmul.f32 %v387_v29, %v1249_v35 }
 0x12f   : > { %v405_v34 = vadd.f32 %v404_v21, %v399_v26  ;;  %v402_v36 = vsub.f32 0.0, %v395_v31  ;;  %v504_v35 = vadd.s32 8, %v1348_v40  ;;  %v512_v52 = vadd.s32 %v511_v20, %v1348_v40 }
 0x130   : > { %v401_v46 = vsub.f32 0.0, %v394_v25  ;;  %v505_v24 = vadd.s32 16, %v1348_v40  ;;  %v506_v58 = vadd.s32 24, %v1348_v40  ;;  %v507_v12 = vadd.s32 32, %v1348_v40 }
 0x131   : > { %v406_v41 = vadd.f32 %v405_v34, %v400_v45  ;;  %v513_v39 = vadd.s32 %v511_v20, %v504_v35  ;;  %vm519_vm8 = vcmp.lt.s32.totalorder %v512_v52, 100  ;;  %v508_v13 = vadd.s32 40, %v1348_v40 }
 0x132   : > { %v514_v30 = vadd.s32 %v511_v20, %v505_v24  ;;  %v515_v4 = vadd.s32 %v511_v20, %v506_v58  ;;  %v516_v11 = vadd.s32 %v511_v20, %v507_v12  ;;  %v509_v31 = vadd.s32 48, %v1348_v40 }
 0x133   : > { %v407_v19 = vadd.f32 %v406_v41, %v401_v46  ;;  %vm520_vm9 = vcmp.lt.s32.totalorder %v513_v39, 100  ;;  %v517_v23 = vadd.s32 %v511_v20, %v508_v13  ;;  %vm578_vm0 = vcmp.eq.s32.totalorder %v1348_v40, 1 }
 0x134   : > { %vm521_vm10 = vcmp.lt.s32.totalorder %v514_v30, 100  ;;  %vm522_vm11 = vcmp.lt.s32.totalorder %v515_v4, 100  ;;  %vm523_vm13 = vcmp.lt.s32.totalorder %v516_v11, 100  ;;  %vm577_vm1 = vcmp.eq.s32.totalorder %v1348_v40, 0 }
 0x135   : > { %v408_v43 = vadd.f32 %v407_v19, %v402_v36  ;;  %vm524_vm14 = vcmp.lt.s32.totalorder %v517_v23, 100  ;;  %v518_v19 = vadd.s32 %v511_v20, %v509_v31 }
 0x137   : > { %409 = vadd.xlane.f32.xlu0 %v408_v43  ;;  %vm525_vm15 = vcmp.lt.s32.totalorder %v518_v19, 100 }
 0x186   : > { %v468_v44 = vpop.xlane.xlu1 %467 }
 0x187   : > { %874 = vlog2.f32 %v468_v44 }
 0x18a   : > { %v472_v27 = vpop.xlane.xlu1 %471  ;;  %v470_v47 = vpop.xlane.xlu0 %469 }
 0x18b   : > { %876 = vlog2.f32 %v472_v27 }
 0x18c   : > { %878 = vlog2.f32 %v470_v47 }
 0x18e   : > { %v474_v28 = vpop.xlane.xlu1 %473 }
 0x18f   : > { %880 = vlog2.f32 %v474_v28 }
 0x191   : > { %v875_v50 = vpop.eup %874 }
 0x192   : > { %v482_v53 = vmul.f32 0.6931472, %v875_v50  ;;  %v476_v54 = vpop.xlane.xlu1 %475 }
 0x193   : > { %882 = vlog2.f32 %v476_v54 }
 0x194   : > { %v495_v56 = vadd.f32 %v482_v53, %v1272_v49  ;;  %v1025_v49 = vmov 0.0  }
 0x195   : > { %v877_v0 = vpop.eup %876  ;;  %v698_v32 = vsel %vm519_vm8, 1.0, %v1025_v49  ;;  %v699_v7 = vsel %vm520_vm9, 1.0, %v1025_v49  ;;  %v700_v38 = vsel %vm521_vm10, 1.0, %v1025_v49  ;;  %v701_v45 = vsel %vm522_vm11, 1.0, %v1025_v49 }
 0x196   : > { %v879_v59 = vpop.eup %878  ;;  %v486_v60 = vmul.f32 0.6931472, %v877_v0  ;;  %v478_v14 = vpop.xlane.xlu1 %477  ;;  %v540_v1 = vsub.f32 %v495_v56, %v1214_v6  ;;  %v702_v34 = vsel %vm523_vm13, 1.0, %v1025_v49  ;;  %v703_v28 = vsel %vm524_vm14, 1.0, %v1025_v49 }
 0x197   : > { %v484_v62 = vmul.f32 0.6931472, %v879_v59  ;;  %884 = vlog2.f32 %v478_v14  ;;  %v704_v20 = vsel %vm525_vm15, 1.0, %v1025_v49 }
 0x198   : > { %v497_v2 = vadd.f32 %v486_v60, %v1275_v51  ;;  %v547_v18 = vmul.f32 %v698_v32, %v540_v1 }
 0x199   : > { %v881_v48 = vpop.eup %880  ;;  %v496_v5 = vadd.f32 %v484_v62, %v1278_v55 }
 0x19a   : > { %v488_v8 = vmul.f32 0.6931472, %v881_v48  ;;  %v480_v9 = vpop.xlane.xlu1 %479  ;;  %v542_v6 = vsub.f32 %v497_v2, %v1216_v10  ;;  %v555_v21 = vsel %vm554_vm12, %v547_v18, 0.0 }
 0x19b   : > { %v541_v17 = vsub.f32 %v496_v5, %v1221_v15  ;;  %886 = vlog2.f32 %v480_v9 }
 0x19c   : > { %v498_v51 = vadd.f32 %v488_v8, %v1281_v57  ;;  %v549_v10 = vmul.f32 %v700_v38, %v542_v6 }
 0x19d   : > { %v883_v22 = vpop.eup %882  ;;  %v548_v55 = vmul.f32 %v699_v7, %v541_v17 }
 0x19e   : > { %v543_v26 = vsub.f32 %v498_v51, %v1223_v16  ;;  %v490_v29 = vmul.f32 0.6931472, %v883_v22  ;;  %v558_v27 = vsel %vm554_vm12, %v549_v10, 0.0 }
 0x19f   : > { %v556_v15 = vsel %vm554_vm12, %v548_v55, 0.0 }
 0x1a0   : > { %v499_v25 = vadd.f32 %v490_v29, %v1284_v61  ;;  %v557_v46 = vadd.f32 %v556_v15, %v555_v21  ;;  %v550_v36 = vmul.f32 %v701_v45, %v543_v26 }
 0x1a1   : > { %v885_v57 = vpop.eup %884 }
 0x1a2   : > { %v544_v41 = vsub.f32 %v499_v25, %v1245_v33  ;;  %v492_v16 = vmul.f32 0.6931472, %v885_v57  ;;  %v559_v35 = vadd.f32 %v558_v27, %v557_v46  ;;  %v560_v52 = vsel %vm554_vm12, %v550_v36, 0.0 }
 0x1a4   : > { %v500_v43 = vadd.f32 %v492_v16, %v1287_v63  ;;  %v551_v44 = vmul.f32 %v702_v34, %v544_v41  ;;  %v561_v54 = vadd.f32 %v560_v52, %v559_v35 }
 0x1a5   : > { %v887_v47 = vpop.eup %886 }
 0x1a6   : > { %v545_v50 = vsub.f32 %v500_v43, %v1252_v37  ;;  %v494_v61 = vmul.f32 0.6931472, %v887_v47  ;;  %v562_v33 = vsel %vm554_vm12, %v551_v44, 0.0 }
 0x1a7   : > { %v563_v56 = vadd.f32 %v562_v33, %v561_v54 }
 0x1a8   : > { %v501_v53 = vadd.f32 %v494_v61, %v1290_v3  ;;  %v552_v24 = vmul.f32 %v703_v28, %v545_v50 }
 0x1aa   : > { %v546_v63 = vsub.f32 %v501_v53, %v1260_v42  ;;  %v564_v39 = vsel %vm554_vm12, %v552_v24, 0.0 }
 0x1ab   : > { %v565_v0 = vadd.f32 %v564_v39, %v563_v56 }
 0x1ac   : > { %v553_v58 = vmul.f32 %v704_v20, %v546_v63 }
 0x1ae   : > { %v566_v37 = vsel %vm554_vm12, %v553_v58, 0.0 }
 0x1af   : > { %v567_v59 = vadd.f32 %v566_v37, %v565_v0 }
 0x1b1   : > { %568 = vadd.xlane.f32.xlu1 %v567_v59 }
 0x1c4   : > { %v410_v30 = vpop.xlane.xlu0 %409 }
 0x1c5   : > { %v411_v60 = vrot.slane %v410_v30, 4 }
 0x1c7   : > { %v412_v3 = vadd.f32 %v411_v60, %v410_v30 }
 0x1c9   : > { %v413_v14 = vrot.slane %v412_v3, 2 }
 0x1cb   : > { %v414_v12 = vadd.f32 %v413_v14, %v412_v3 }
 0x1cd   : > { %v415_v62 = vrot.slane %v414_v12, 1 }
 0x1cf   : > { %v416_v1 = vadd.f32 %v415_v62, %v414_v12 }
 0x1d1   : > { %742 = vpush %v416_v1 }
 0x202   : > { %s743_s8 = spop %742 }
 0x203   : > { %v581_v7 = vstv %s743_s8 }
 0x23e   : > { %v569_v42 = vpop.xlane.xlu1 %568 }
 0x23f   : > { %v570_v2 = vrot.slane %v569_v42, 4 }
 0x241   : > { %v571_v4 = vadd.f32 %v570_v2, %v569_v42 }
 0x243   : > { %v572_v48 = vrot.slane %v571_v4, 2 }
 0x245   : > { %v573_v49 = vadd.f32 %v572_v48, %v571_v4 }
 0x247   : > { %v574_v32 = vrot.slane %v573_v49, 1 }
 0x249   : > { %v575_v5 = vadd.f32 %v574_v32, %v573_v49 }
 0x24b   : > { %744 = vpush %v575_v5 }
 0x27c   : > { %s745_s23 = spop %744 }
 0x27d   : > { %v579_v13 = vstv %s745_s23 }
 0x27e   : > { %v580_v8 = vsel %vm578_vm0, %v579_v13, 0.0 }
 0x27f   : > { %v582_v9 = vsel %vm577_vm1, %v581_v7, %v580_v8 }
 0x280   : > { %583 = vst [vmem:[%s201_s16] sm:$0xff] %v582_v9 }
 0x281   : > { %961 = shalt.err (!%p958_p11)
}
 0x282   : > { %s962_s30 = scalar_lea.hbm %s1385_s24, 128  ;;  %s966_s22 = scalar_lea.hbm %s1431_s2, 256 }
 0x283   : > { %p963_p3 = scmp.ne.s32.totalorder %s1385_s24, %s962_s30  ;;  %p967_p2 = scmp.lt.u32.totalorder %s1385_s24, %s1431_s2 }
 0x284   : > { %p968_p4 = scmp.lt.u32.totalorder %s966_s22, %s962_s30  ;;  %p970_p13 = scmp.lt.u32.totalorder %s962_s30, %s1385_s24 }
 0x285   : > { %p964_p8 = pnand %p963_p3, %p1440_p1 }
 0x286   : > { %p969_p6 = por %p968_p4, %p967_p2 }
 0x287   : > { %p965_p0 = pneg %p964_p8 }
 0x288   : > { %p971_p12 = por %p970_p13, %p969_p6 }
 0x28a   : > { %p972_p10 = pnand %p971_p12, %p965_p0 }
 0x28c   : > { %975 = shalt.err (!%p972_p10)
}
 0x28d   : > { %750 = dma.vmem_to_hbm [thread:$0]  (%p1440_p1), %s1387_s27, 128, %s1385_s24, %s585_s13  }
 0x28e PF: > { %s610_s4 = sand.u32 1, %s1006_s9   ;;  %p1441_p5 = scmp.ne.s32.totalorder %s1436_s21, 0 }
 0x28f   : > { %p1442_p7 = scmp.ge.s32.totalorder %s1018_s12, 2  ;;  %s611_s5 = scalar_lea.sflag [#allocation4], %s610_s4 }
 0x291   : > { %p760_p9 = pnand %p1442_p7, %p1441_p5 }
 0x293   : > { %1001 = dma.done.wait (!%p760_p9), %s611_s5, 128  }
 0x294   : > { %1003 = vsyncadd (!%p760_p9), %s611_s5, 4294967168  ;;  %p18_p11 = scmp.ge.s32.totalorder %s1067_s15, 4   ;;  %s1443_s9 = smov %s1010_s10 }
 0x295   : > { %s1444_s10 = smov %s1014_s11  ;;  %s1445_s11 = smov %s1079_s18 }
 0x296   : > { %s1446_s12 = smov %s1067_s15  ;;  %20 = sbr.rel (!%p18_p11) target bundleno = 7 (0x7), region = 86 }
 0x29d   :  { %616 = vsyncpa [#allocation3], 1 }
 0x29e   :  { %618 = vsyncpa [#allocation3 + $0x1], 1 }
 0x29f   :  { %619 = vsyncpa [#allocation6], 1 }
 0x2a0   :  { %621 = vsyncpa [#allocation6 + $0x1], 1 }
 0x2a1   :  { %622 = vsyncpa [#allocation4], 1 }
 0x2a2   :  { %624 = vsyncpa [#allocation4 + $0x1], 1 }

</bundles_post_ra>
